<compile_context>
chip_gen: v7x
topology: tpu7x:2x2x1
jax: 0.10.0
libtpu: 0.0.40
codegen_flags: <defaults>
</compile_context>

<pallas_src>
import functools
import math

import jax
import jax.numpy as jnp
from jax.experimental import pallas as pl
from jax.experimental.pallas import tpu as pltpu


# -------------------- one-time pltpu.roll direction probe -------------------
# The conv needs taps t[p] = x[p + off].  With np.roll semantics
# (result[i] = x[i - shift]) that is roll(x, -off).  A one-element probe at
# prep time pins the convention on the installed Mosaic version; it runs once,
# completely off the forward path.

_ROLL_SIGN = None


def _probe_roll_sign():
    global _ROLL_SIGN
    if _ROLL_SIGN is None:
        def probe_kernel(x_ref, o_ref):
            o_ref[...] = pltpu.roll(x_ref[...], 1, axis=1)

        x = jax.lax.broadcasted_iota(jnp.float32, (8, 128), 1)
        y = pl.pallas_call(
            probe_kernel,
            out_shape=jax.ShapeDtypeStruct((8, 128), jnp.float32),
        )(x)
        y00 = float(jax.device_get(y)[0, 0])
        # np.roll(iota, 1)[0] == 127  =>  roll(x, s)[p] = x[p - s]  =>  shift = -off
        _ROLL_SIGN = -1 if y00 == 127.0 else 1
    return _ROLL_SIGN


# ---------------------------- fused Pallas kernel ---------------------------

def _make_fused_kernel(*, batch, c_in, c_out, h, w, kh, kw, roll_sign):
    hw = h * w
    bhw = batch * hw
    ph, pw = (kh - 1) // 2, (kw - 1) // 2

    def kernel(xt_ref, wc_ref, cb_ref, w2_ref, lb_ref, out_ref, flat_ref):
        """Conv2d(pad=1)+bias+ReLU -> NCHW flatten -> Linear(+bias), VMEM-resident.

        xt_ref  : (C_in, B*H*W)        x channel-major; column p = b*HW + h*W + w
        wc_ref  : (KH*KW, C_out, C_in) conv weight, tap-major
        cb_ref  : (C_out, 1)           conv bias
        w2_ref  : (C_out*H*W, Np)      linear weight (pre-transposed, lane-padded)
        lb_ref  : (1, Np)              linear bias (lane-padded)
        out_ref : (B, Np)
        flat_ref: (B, C_out*H*W)       scratch: PyTorch-NCHW flattened activations
        """
        xt = xt_ref[...]                                          # (C_in, BHW)
        lane = jax.lax.broadcasted_iota(jnp.int32, (c_in, bhw), 1)
        col = lane % w              # w coordinate of the output pixel
        row = (lane // w) % h       # h coordinate of the output pixel

        # --- children 1+2: Conv2d + bias + ReLU ------------------------------
        # y[co, p] = sum_{t=(di,dj)} sum_ci wc[t,co,ci] * x[ci, p + dh*W + dw],
        # zero padding handled by the boundary masks (which also kill any
        # roll wrap-around across image/batch boundaries).
        acc = jnp.zeros((c_out, bhw), jnp.float32)
        for di in range(kh):
            for dj in range(kw):
                dh, dw = di - ph, dj - pw
                off = dh * w + dw
                tap = xt if off == 0 else pltpu.roll(
                    xt, (roll_sign * off) % bhw, axis=1)
                conds = []
                if dh < 0:
                    conds.append(row >= -dh)
                if dh > 0:
                    conds.append(row < h - dh)
                if dw < 0:
                    conds.append(col >= -dw)
                if dw > 0:
                    conds.append(col < w - dw)
                if conds:
                    tap = jnp.where(functools.reduce(jnp.logical_and, conds),
                                    tap, 0.0)
                acc = acc + jnp.dot(wc_ref[di * kw + dj], tap,
                                    preferred_element_type=jnp.float32)
        yt = jnp.maximum(acc + cb_ref[...], 0.0)                  # (C_out, BHW)

        # --- child 3: Flatten, PyTorch NCHW order -----------------------------
        # flat[b, c*HW + q] = yt[c, b*HW + q]; static, 128-lane-aligned stores,
        # written straight from the value (no intermediate yt scratch).
        for b in range(batch):
            for c in range(c_out):
                flat_ref[b:b + 1, c * hw:(c + 1) * hw] = \
                    yt[c:c + 1, b * hw:(b + 1) * hw]

        # --- child 4: Linear + bias -------------------------------------------
        out = jnp.dot(flat_ref[...], w2_ref[...],
                      preferred_element_type=jnp.float32) + lb_ref[...]
        out_ref[...] = out.astype(out_ref.dtype)

    return kernel


def _fused_forward(xt, wc, cb, w2p, lbp, *, batch, c_in, c_out, h, w, kh, kw,
                   roll_sign):
    hw = h * w
    bhw = batch * hw
    feat = c_out * hw
    n_pad = w2p.shape[1]

    kernel = _make_fused_kernel(batch=batch, c_in=c_in, c_out=c_out, h=h, w=w,
                                kh=kh, kw=kw, roll_sign=roll_sign)

    def full(shape):
        return pl.BlockSpec(shape, lambda i: (0,) * len(shape))

    flops = 2 * c_out * (kh * kw * c_in) * bhw + 2 * batch * feat * n_pad
    bytes_accessed = 4 * (c_in * bhw + kh * kw * c_out * c_in + c_out
                          + feat * n_pad + n_pad + batch * n_pad)

    return pl.pallas_call(
        kernel,
        out_shape=jax.ShapeDtypeStruct((batch, n_pad), jnp.float32),
        grid=(1,),
        in_specs=[full((c_in, bhw)),
                  full((kh * kw, c_out, c_in)),
                  full((c_out, 1)),
                  full((feat, n_pad)),
                  full((1, n_pad))],
        out_specs=full((batch, n_pad)),
        scratch_shapes=[pltpu.VMEM((batch, feat), jnp.float32)],
        cost_estimate=pl.CostEstimate(flops=flops, transcendentals=0,
                                      bytes_accessed=bytes_accessed),
        # NOTE(v7x): grid=(1,) -> one TensorCore.  If batch grows beyond toy
        # size, add a leading 'parallel' batch axis (block xt columns and
        # flat/out rows per batch chunk) to use the second core; at B=2 the
        # kernel is dispatch-bound, not compute- or VMEM-bound.
        compiler_params=pltpu.CompilerParams(
            dimension_semantics=("arbitrary",)),
    )(xt, wc, cb, w2p, lbp)


# ----------------------------- params & forward -----------------------------

def init_params(key, c_in=4, c_out=8, kh=3, kw=3, h=16, w=16, n_cls=10):
    k1, k2, k3, k4 = jax.random.split(key, 4)
    conv_w = jax.random.normal(k1, (c_out, c_in, kh, kw), jnp.float32) * 0.1
    conv_b = jax.random.normal(k2, (c_out,), jnp.float32) * 0.1
    lin_w = jax.random.normal(k3, (n_cls, c_out * h * w), jnp.float32) * 0.02
    lin_b = jax.random.normal(k4, (n_cls,), jnp.float32) * 0.02
    return {"conv_w": conv_w, "conv_b": conv_b, "lin_w": lin_w, "lin_b": lin_b}


def prepare_params(params, n_pad=128):
    """One-time weight prep: all reshapes/transposes/padding off the fwd path."""
    conv_w = params["conv_w"]                          # (C_out, C_in, KH, KW)
    c_out, c_in, kh, kw = conv_w.shape
    # wc[t] = conv_w[:, :, di, dj] for t = di*KW + dj   -> (KH*KW, C_out, C_in)
    wc = jnp.transpose(conv_w, (2, 3, 0, 1)).reshape(kh * kw, c_out, c_in)
    cb = params["conv_b"].reshape(c_out, 1)
    # Linear weight pre-transposed (feature order = PyTorch NCHW flatten order,
    # exactly what the in-kernel flatten produces) and zero-padded to 128 lanes
    # so the big weight DMA is contiguous and the output store is unmasked.
    lin_w, lin_b = params["lin_w"], params["lin_b"]
    n_cls, feat = lin_w.shape
    w2p = jnp.zeros((feat, n_pad), jnp.float32).at[:, :n_cls].set(lin_w.T)
    lbp = jnp.zeros((1, n_pad), jnp.float32).at[:, :n_cls].set(lin_b[None, :])
    _probe_roll_sign()                                 # pin pltpu.roll convention
    return {"wc": wc, "cb": cb, "w2p": w2p, "lbp": lbp}


@functools.partial(jax.jit, static_argnames=("n_cls",))
def custom_model_forward(x_nchw, prepped, n_cls=10):
    """Mirrors Custom_model.forward: Conv2d -> ReLU -> Flatten -> Linear."""
    wc, cb, w2p, lbp = prepped["wc"], prepped["cb"], prepped["w2p"], prepped["lbp"]
    b, c_in, h, w = x_nchw.shape
    ntaps, c_out, _ = wc.shape
    kh = kw = math.isqrt(ntaps)                        # 3x3 kernel

    # Only XLA glue: channel-major layout (C_in, B*H*W), column p = b*HW+h*W+w.
    xt = x_nchw.transpose(1, 0, 2, 3).reshape(c_in, b * h * w)

    roll_sign = _ROLL_SIGN if _ROLL_SIGN is not None else -1
    out_pad = _fused_forward(xt, wc, cb, w2p, lbp,
                             batch=b, c_in=c_in, c_out=c_out, h=h, w=w,
                             kh=kh, kw=kw, roll_sign=roll_sign)
    return out_pad[:, :n_cls]


# -------------------------- pure-JAX reference ------------------------------

def reference_forward(x_nchw, params):
    y = jax.lax.conv_general_dilated(
        x_nchw, params["conv_w"], window_strides=(1, 1),
        padding=((1, 1), (1, 1)),
        dimension_numbers=("NCHW", "OIHW", "NCHW"),
        precision=jax.lax.Precision.HIGHEST)
    y = jnp.maximum(y + params["conv_b"][None, :, None, None], 0.0)
    y = y.reshape(y.shape[0], -1)
    return (jnp.dot(y, params["lin_w"].T, precision=jax.lax.Precision.HIGHEST)
            + params["lin_b"][None, :])


# ----------------------------------- main -----------------------------------

if __name__ == "__main__":
    key = jax.random.PRNGKey(0)
    kp, kx = jax.random.split(key)
    params = init_params(kp)
    prepped = prepare_params(params)
    x = jax.random.normal(kx, (2, 4, 16, 16), jnp.float32)      # NCHW input

    out = custom_model_forward(x, prepped, n_cls=10)
    out = jax.block_until_ready(out)
    assert out.shape == (2, 10) and out.dtype == jnp.float32

    ref = jax.block_until_ready(reference_forward(x, params))
    assert jnp.allclose(out, ref, rtol=1e-2, atol=1e-2), \
        f"mismatch vs reference: max abs err {jnp.max(jnp.abs(out - ref))}"
    print("KERNEL_OK")
</pallas_src>

<mosaic_0001>
module attributes {stable_mosaic.version = 11 : i64} {
  func.func @probe_kernel(%arg0: memref<8x128xf32, #tpu.memory_space<vmem>>, %arg1: memref<8x128xf32, #tpu.memory_space<vmem>>) attributes {dimension_semantics = [], scalar_prefetch = 0 : i64, scratch_operands = 0 : i64, tpu.core_type = #tpu.core_type<tc>} {
    %c0 = arith.constant 0 : index
    %c0_0 = arith.constant 0 : index
    %0 = vector.load %arg0[%c0, %c0_0] : memref<8x128xf32, #tpu.memory_space<vmem>>, vector<8x128xf32>
    %c1_i32 = arith.constant 1 : i32
    %1 = tpu.dynamic_rotate %0 by %c1_i32 dim 1 : vector<8x128xf32>, i32 -> vector<8x128xf32>
    %c0_1 = arith.constant 0 : index
    %c0_2 = arith.constant 0 : index
    %2 = vector.load %arg1[%c0_1, %c0_2] : memref<8x128xf32, #tpu.memory_space<vmem>>, vector<8x128xf32>
    tpu.vector_store %arg1[%c0_1, %c0_2], %1 {strides = array<i32>} : memref<8x128xf32, #tpu.memory_space<vmem>>, vector<8x128xf32>,
    return
  }
}

</mosaic_0001>

<bundles_post_ra>
// kernel: tpu_custom_call.1
= control target key start
LH: loop header
LB: loop body
LE: loop exit
PB: predicated region body
PF: predicated region fallthrough
CT: control target
= control target key end

     0   :  { %6 = vsyncpa [#allocation3], 0  ;;  %s128_s0 = inlined_call_operand.hbm [shape: f32[8,128], index: 0, kind: input, shape index: {}]   ;;  %s129_s1 = inlined_call_operand.hbm [shape: f32[8,128], index: 1, kind: output, shape index: {}]  }
   0x1   :  { %7 = vsyncpa [#allocation4], 0  ;;  %s91_s6 = smov [#allocation2]   ;;  %s43_s10 = scalar_lea.hbm %s128_s0, 128 }
   0x2   :  { %s14_s7 = sshll.u32 %s91_s6, 4  ;;  %p44_p0 = scmp.ne.s32.totalorder %s128_s0, %s43_s10  ;;  %s15_s7 = int_to_ptr.vmem [resolvable:$true] %s14_s7 }
   0x3   :  { %p47_p1 = scmp.lt.u32.totalorder %s43_s10, %s128_s0 }
   0x5   :  { %p49_p2 = pnand %p47_p1, %p44_p0 }
   0x7   :  { %52 = shalt.err (!%p49_p2)
}
   0x8   :  { %s53_s15 = scalar_lea.vmem %s15_s7, 128  ;;  %p58_p4 = scmp.lt.s32.totalorder %s15_s7, %s15_s7 }
   0x9   :  { %p54_p3 = scmp.ne.s32.totalorder %s15_s7, %s53_s15  ;;  %p59_p5 = scmp.lt.s32.totalorder %s53_s15, %s53_s15 }
   0xb   :  { %p60_p6 = por %p59_p5, %p58_p4 }
   0xd   :  { %p61_p7 = pnand %p60_p6, %p54_p3 }
   0xf   :  { %64 = shalt.err (!%p61_p7)
}
  0x10   :  { %17 = dma.hbm_to_vmem [thread:$0]  %s128_s0, 128, %s15_s7, [#allocation3]  }
  0x11   :  { %87 = dma.done.wait [#allocation3], 128  }
  0x12   :  { %88 = vsyncadd [#allocation3], 4294967168  ;;  %v21_v0 = vld [vmem:[#allocation2] sm:$0xff]  ;;  %s92_s18 = smov 1   ;;  %s93_s19 = smov [#allocation5]  }
  0x13   :  { %22 = vrot.lane.b32.xlu0 %v21_v0, %s92_s18  ;;  %s31_s20 = sshll.u32 %s93_s19, 4  ;;  %s32_s20 = int_to_ptr.vmem [resolvable:$true] %s31_s20 }
  0x14   :  { %s65_s21 = scalar_lea.vmem %s32_s20, 128  ;;  %p70_p9 = scmp.lt.s32.totalorder %s32_s20, %s32_s20 }
  0x15   :  { %p66_p8 = scmp.ne.s32.totalorder %s32_s20, %s65_s21  ;;  %p71_p10 = scmp.lt.s32.totalorder %s65_s21, %s65_s21 }
  0x17   :  { %p72_p11 = por %p71_p10, %p70_p9 }
  0x19   :  { %p73_p12 = pnand %p72_p11, %p66_p8 }
  0x85   :  { %v23_v1 = vpop.permute.xlu0 %22 }
  0x86   :  { %24 = vst [vmem:[#allocation5] sm:$0xff] %v23_v1 }
  0x87   :  { %76 = shalt.err (!%p73_p12)
}
  0x88   :  { %s77_s0 = scalar_lea.hbm %s129_s1, 128 }
  0x89   :  { %p78_p13 = scmp.ne.s32.totalorder %s129_s1, %s77_s0  ;;  %p81_p0 = scmp.lt.u32.totalorder %s77_s0, %s129_s1 }
  0x8b   :  { %p83_p1 = pnand %p81_p0, %p78_p13 }
  0x8d   :  { %86 = shalt.err (!%p83_p1)
}
  0x8e   :  { %34 = dma.vmem_to_hbm [thread:$0]  %s32_s20, 128, %s129_s1, [#allocation4]  }
  0x8f   :  { %89 = dma.done.wait [#allocation4], 128  }
  0x90   :  { %90 = vsyncadd [#allocation4], 4294967168 }
  0x91   :  { %38 = vsyncpa [#allocation3], 1 }
  0x92   :  { %39 = vsyncpa [#allocation4], 1 }

</bundles_post_ra>
